<compile_context>
chip_gen: v7x
topology: tpu7x:2x2x1
jax: 0.10.0
libtpu: 0.0.40
codegen_flags: <defaults>
</compile_context>

<pallas_src>
import math

import jax
import jax.numpy as jnp
from jax.experimental import pallas as pl
from jax.experimental.pallas import tpu as pltpu


def _round_up(a: int, b: int) -> int:
    return ((a + b - 1) // b) * b


def _choose_k_tile(d: int, max_tk: int):
    """Pick a K (in_channels) tile and the padded D.

    Prefers (a) a single full-D block, else (b) a lane-aligned tile that
    divides D exactly (no padding copy of x or W6), else (c) pads D.
    """
    max_tk = max(128, max_tk - (max_tk % 128))
    if d <= max_tk:
        return d, d                                   # single K step, no pad
    if d % 128 == 0:
        for tk in range(max_tk, 127, -128):
            if d % tk == 0:
                return tk, d                          # exact divisor, no pad
    return max_tk, _round_up(d, max_tk)               # fallback: pad K


def _choose_m_tile(n: int, max_tm: int, min_m_tiles: int):
    """Pick an 8-aligned M (ROI) tile; keep >= min_m_tiles tiles when possible
    so v7x's two TensorCores both get work on the 'parallel' axis."""
    n8 = _round_up(max(n, 1), 8)
    if n8 <= max_tm:
        if min_m_tiles > 1 and n8 >= 8 * min_m_tiles:
            return _round_up(pl.cdiv(n, min_m_tiles), 8)
        return n8
    return max_tm


def _resident_spec(block_shape, index_map, single_buffer: bool):
    """BlockSpec for a constant-index (VMEM-resident) operand.

    With single_buffer=True and a jax that supports pipeline_mode, drop the
    second (useless) pipeline buffer to free VMEM headroom (v7x: 64 MiB/TC).
    """
    if single_buffer and hasattr(pl, "Buffered"):
        try:
            return pl.BlockSpec(block_shape, index_map,
                                pipeline_mode=pl.Buffered(1))
        except TypeError:
            pass
    return pl.BlockSpec(block_shape, index_map)


def _two_mlp_head_kernel(x_ref, w6t_ref, b6_ref, w7t_ref, b7_ref, o_ref,
                         acc_ref):
    """Grid = (M tiles, K tiles); K (reduction over in_channels) is last."""
    k = pl.program_id(1)

    # Cast the streamed x tile to the MXU compute dtype in-kernel (x arrives
    # in its producer dtype; no wrapper-side HBM cast pass).
    x_tile = x_ref[...].astype(w6t_ref.dtype)

    # fc6 partial sum: [tm, tk] @ [tk, R] (weights prepacked as W6.T) -> f32.
    partial = jnp.dot(x_tile, w6t_ref[...], preferred_element_type=jnp.float32)

    @pl.when(k == 0)
    def _first():
        acc_ref[...] = partial            # write-on-first-step (no zero fill)

    @pl.when(k > 0)
    def _rest():
        acc_ref[...] += partial

    @pl.when(k == pl.num_programs(1) - 1)
    def _finalize():
        # Bias + ReLU once, fused fc7 matmul on the resident W7.T tile,
        # bias + ReLU, single lane-dense store.
        h = jnp.maximum(acc_ref[...] + b6_ref[...], 0.0)
        y = jnp.dot(h.astype(w7t_ref.dtype), w7t_ref[...],
                    preferred_element_type=jnp.float32)
        y = jnp.maximum(y + b7_ref[...], 0.0)
        o_ref[...] = y.astype(o_ref.dtype)


def prepack_two_mlp_head(w6, b6, w7, b7, *, compute_dtype=jnp.bfloat16,
                         max_tk=1792):
    """One-time weight prep (OUTSIDE the hot path — cache the result).

    w6: [R, D], b6: [R], w7: [R, R], b7: [R]   (PyTorch nn.Linear [out, in]).
    Returns a dict of device arrays in kernel-ready layout:
      w6t: [d_pad, R] compute_dtype (= W6.T, zero-padded along K if needed)
      w7t: [R, R]     compute_dtype (= W7.T)
      b6, b7: [1, R]  float32
    plus the tiling constants chosen for this D.
    """
    R, D = w6.shape
    assert w7.shape == (R, R) and b6.shape == (R,) and b7.shape == (R,)
    assert R % 128 == 0, "representation_size must be a multiple of 128"

    tk, d_pad = _choose_k_tile(D, max_tk)

    w6t = jnp.transpose(w6).astype(compute_dtype)          # [D, R]
    if d_pad != D:
        w6t = jnp.pad(w6t, ((0, d_pad - D), (0, 0)))
    w7t = jnp.transpose(w7).astype(compute_dtype)           # [R, R]
    b6_2d = b6.reshape(1, R).astype(jnp.float32)
    b7_2d = b7.reshape(1, R).astype(jnp.float32)

    return dict(w6t=w6t, w7t=w7t, b6=b6_2d, b7=b7_2d,
                r=R, d=D, d_pad=d_pad, tk=tk,
                compute_dtype=jnp.dtype(compute_dtype))


def two_mlp_head(x, params, *, max_tm=512, min_m_tiles=2,
                 single_buffer_resident=True):
    """Hot path.  x: [N, C, H, W] (or [N, D]); params from prepack_two_mlp_head.

    Returns relu(relu(flatten(x) @ W6.T + b6) @ W7.T + b7) as [N, R] in x.dtype.
    """
    N = x.shape[0]
    D = math.prod(x.shape[1:])
    assert D == params["d"], "input feature size does not match prepacked W6"
    R = params["r"]
    tk, d_pad = params["tk"], params["d_pad"]
    out_dtype = x.dtype

    tm = _choose_m_tile(N, max_tm, min_m_tiles)

    # Flatten is layout-free; no dtype cast, no M-axis pad (Pallas boundary
    # masking handles the ragged ROI edge — rows are independent).
    x_flat = x.reshape(N, D)
    if d_pad != D:
        # K padding must be explicit (it feeds the reduction); only taken when
        # no lane-aligned tk divides D.
        x_flat = jnp.pad(x_flat, ((0, 0), (0, d_pad - D)))

    grid = (pl.cdiv(N, tm), d_pad // tk)

    # VMEM budget (double-buffered streaming tiles + resident W7/biases + acc),
    # capped generation-aware: v5e/v6e have 128 MiB VMEM, v7x only 64 MiB/TC.
    res_bufs = 1 if (single_buffer_resident and hasattr(pl, "Buffered")) else 2
    xsz = jnp.dtype(x_flat.dtype).itemsize
    wsz = jnp.dtype(params["compute_dtype"]).itemsize
    osz = jnp.dtype(out_dtype).itemsize
    footprint = (2 * tm * tk * xsz            # x tile (double-buffered)
                 + 2 * tk * R * wsz           # W6.T tile (double-buffered)
                 + tm * R * 4                 # f32 accumulator scratch
                 + res_bufs * R * R * wsz     # W7.T (resident)
                 + 2 * tm * R * osz           # output tile
                 + res_bufs * 2 * R * 4)      # biases
    try:
        phys_vmem = int(pltpu.get_tpu_info().vmem_capacity_bytes)
    except Exception:  # pragma: no cover - older jax / no device info
        phys_vmem = 64 << 20                  # conservative: v7x per-TC VMEM
    vmem_cap = min(phys_vmem * 3 // 4, 100 << 20)
    vmem_limit = int(min(max(footprint * 5 // 4 + (4 << 20), 16 << 20),
                         vmem_cap))

    return pl.pallas_call(
        _two_mlp_head_kernel,
        out_shape=jax.ShapeDtypeStruct((N, R), out_dtype),
        grid_spec=pltpu.PrefetchScalarGridSpec(
            num_scalar_prefetch=0,
            grid=grid,
            in_specs=[
                # x tile streams (producer dtype; cast to bf16 in-kernel)
                pl.BlockSpec((tm, tk), lambda i, k: (i, k)),
                # W6.T tile streams along K
                pl.BlockSpec((tk, R), lambda i, k: (k, 0)),
                # resident operands (constant index maps)
                _resident_spec((1, R), lambda i, k: (0, 0),
                               single_buffer_resident),          # b6
                _resident_spec((R, R), lambda i, k: (0, 0),
                               single_buffer_resident),          # W7.T
                _resident_spec((1, R), lambda i, k: (0, 0),
                               single_buffer_resident),          # b7
            ],
            out_specs=pl.BlockSpec((tm, R), lambda i, k: (i, 0)),
            scratch_shapes=[pltpu.VMEM((tm, R), jnp.float32)],
        ),
        compiler_params=pltpu.CompilerParams(
            dimension_semantics=("parallel", "arbitrary"),
            vmem_limit_bytes=vmem_limit,
        ),
    )(x_flat, params["w6t"], params["b6"], params["w7t"], params["b7"])


if __name__ == "__main__":
    # TwoMLPHead(in_channels=C*H*W, representation_size=R) at small shapes.
    N, C, H, W = 2, 4, 16, 16
    D = C * H * W          # in_channels = 1024
    R = 128                # representation_size

    key = jax.random.PRNGKey(0)
    kx, kw6, kb6, kw7, kb7 = jax.random.split(key, 5)

    x = jax.random.normal(kx, (N, C, H, W), dtype=jnp.float32)
    # PyTorch nn.Linear weight layout is [out, in].
    w6 = jax.random.normal(kw6, (R, D), dtype=jnp.float32) * 0.02
    b6 = jax.random.normal(kb6, (R,), dtype=jnp.float32) * 0.01
    w7 = jax.random.normal(kw7, (R, R), dtype=jnp.float32) * 0.02
    b7 = jax.random.normal(kb7, (R,), dtype=jnp.float32) * 0.01

    # One-time weight prepack (outside the hot path, cached by the caller).
    # max_tk=512 -> 2 K steps at D=1024, exercising the accumulator pipeline.
    params = prepack_two_mlp_head(w6, b6, w7, b7, max_tk=512)

    try:
        out = two_mlp_head(x, params, single_buffer_resident=True)
    except Exception:
        # Fallback for jax builds without BlockSpec pipeline_mode support.
        out = two_mlp_head(x, params, single_buffer_resident=False)
    out = jax.block_until_ready(out)
    assert out.shape == (N, R) and out.dtype == x.dtype

    xf = x.reshape(N, D)

    # Precision-matched reference (bf16 operands, f32 accumulation): tight tol.
    xb = xf.astype(jnp.bfloat16)
    w6tb = w6.T.astype(jnp.bfloat16)
    w7tb = w7.T.astype(jnp.bfloat16)
    h = jnp.maximum(
        jnp.dot(xb, w6tb, preferred_element_type=jnp.float32) + b6, 0.0)
    ref_bf16 = jnp.maximum(
        jnp.dot(h.astype(jnp.bfloat16), w7tb,
                preferred_element_type=jnp.float32) + b7, 0.0)
    assert jnp.allclose(out, ref_bf16, atol=2e-3, rtol=2e-3)

    # Full-f32 module semantics: looser tolerance for the bf16 compute path.
    ref_f32 = jnp.maximum(xf @ w6.T + b6, 0.0)
    ref_f32 = jnp.maximum(ref_f32 @ w7.T + b7, 0.0)
    assert jnp.allclose(out, ref_f32, atol=3e-2, rtol=3e-2)

    print("KERNEL_OK")
</pallas_src>

<mosaic_0001>
module attributes {stable_mosaic.version = 11 : i64} {
  func.func @_two_mlp_head_kernel(%arg0: i32, %arg1: i32, %arg2: memref<8x512xf32, #tpu.memory_space<vmem>>, %arg3: memref<512x128xbf16, #tpu.memory_space<vmem>>, %arg4: memref<1x128xf32, #tpu.memory_space<vmem>>, %arg5: memref<128x128xbf16, #tpu.memory_space<vmem>>, %arg6: memref<1x128xf32, #tpu.memory_space<vmem>>, %arg7: memref<8x128xf32, #tpu.memory_space<vmem>>, %arg8: memref<8x128xf32, #tpu.memory_space<vmem>>) attributes {dimension_semantics = [#tpu.dimension_semantics<parallel>, #tpu.dimension_semantics<arbitrary>], iteration_bounds = array<i64: 1, 2>, scalar_prefetch = 0 : i64, scratch_operands = 1 : i64, tpu.core_type = #tpu.core_type<tc>, window_params = [{transform_indices = @transform_0, window_bounds = array<i64: 8, 512>}, {transform_indices = @transform_1, window_bounds = array<i64: 512, 128>}, {pipeline_mode = #tpu.pipeline_mode<synchronous>, transform_indices = @transform_2, window_bounds = array<i64: 1, 128>}, {pipeline_mode = #tpu.pipeline_mode<synchronous>, transform_indices = @transform_3, window_bounds = array<i64: 128, 128>}, {pipeline_mode = #tpu.pipeline_mode<synchronous>, transform_indices = @transform_4, window_bounds = array<i64: 1, 128>}, {transform_indices = @transform_5, window_bounds = array<i64: 8, 128>}]} {
    %c0 = arith.constant 0 : index
    %c0_0 = arith.constant 0 : index
    %0 = vector.load %arg2[%c0, %c0_0] : memref<8x512xf32, #tpu.memory_space<vmem>>, vector<8x512xf32>
    %1 = arith.truncf %0 : vector<8x512xf32> to vector<8x512xbf16>
    %c0_1 = arith.constant 0 : index
    %c0_2 = arith.constant 0 : index
    %2 = vector.load %arg3[%c0_1, %c0_2] : memref<512x128xbf16, #tpu.memory_space<vmem>>, vector<512x128xbf16>
    %cst = arith.constant dense<0.000000e+00> : vector<8x128xf32>
    %3 = tpu.matmul %1, %2, %cst {dimension_numbers = #tpu.dot_dimension_numbers<[1], [0], [0], [1], [0, 0, 1, 1], [], []>} : vector<8x512xbf16>, vector<512x128xbf16>, vector<8x128xf32> -> vector<8x128xf32>
    %c0_i32 = arith.constant 0 : i32
    %4 = arith.cmpi eq, %arg1, %c0_i32 : i32
    %5 = arith.extui %4 : i1 to i32
    %c0_i32_3 = arith.constant 0 : i32
    %6 = arith.cmpi ne, %5, %c0_i32_3 : i32
    scf.if %6 {
      %c0_7 = arith.constant 0 : index
      %c0_8 = arith.constant 0 : index
      %13 = vector.load %arg8[%c0_7, %c0_8] : memref<8x128xf32, #tpu.memory_space<vmem>>, vector<8x128xf32>
      tpu.vector_store %arg8[%c0_7, %c0_8], %3 {strides = array<i32>} : memref<8x128xf32, #tpu.memory_space<vmem>>, vector<8x128xf32>,
    } else {
    }
    %c0_i32_4 = arith.constant 0 : i32
    %7 = arith.cmpi sgt, %arg1, %c0_i32_4 : i32
    %8 = arith.extui %7 : i1 to i32
    %c0_i32_5 = arith.constant 0 : i32
    %9 = arith.cmpi ne, %8, %c0_i32_5 : i32
    scf.if %9 {
      %c0_7 = arith.constant 0 : index
      %c0_8 = arith.constant 0 : index
      %13 = vector.load %arg8[%c0_7, %c0_8] : memref<8x128xf32, #tpu.memory_space<vmem>>, vector<8x128xf32>
      %14 = arith.addf %13, %3 : vector<8x128xf32>
      %c0_9 = arith.constant 0 : index
      %c0_10 = arith.constant 0 : index
      %15 = vector.load %arg8[%c0_9, %c0_10] : memref<8x128xf32, #tpu.memory_space<vmem>>, vector<8x128xf32>
      tpu.vector_store %arg8[%c0_9, %c0_10], %14 {strides = array<i32>} : memref<8x128xf32, #tpu.memory_space<vmem>>, vector<8x128xf32>,
    } else {
    }
    %c1_i32 = arith.constant 1 : i32
    %10 = arith.cmpi eq, %arg1, %c1_i32 : i32
    %11 = arith.extui %10 : i1 to i32
    %c0_i32_6 = arith.constant 0 : i32
    %12 = arith.cmpi ne, %11, %c0_i32_6 : i32
    scf.if %12 {
      %c0_7 = arith.constant 0 : index
      %c0_8 = arith.constant 0 : index
      %13 = vector.load %arg8[%c0_7, %c0_8] : memref<8x128xf32, #tpu.memory_space<vmem>>, vector<8x128xf32>
      %c0_9 = arith.constant 0 : index
      %c0_10 = arith.constant 0 : index
      %14 = vector.load %arg4[%c0_9, %c0_10] : memref<1x128xf32, #tpu.memory_space<vmem>>, vector<1x128xf32>
      %15 = vector.broadcast %14 : vector<1x128xf32> to vector<8x128xf32>
      %16 = arith.addf %13, %15 : vector<8x128xf32>
      %cst_11 = arith.constant 0.000000e+00 : f32
      %17 = vector.broadcast %cst_11 : f32 to vector<8x128xf32>
      %18 = arith.maximumf %16, %17 : vector<8x128xf32>
      %19 = arith.truncf %18 : vector<8x128xf32> to vector<8x128xbf16>
      %c0_12 = arith.constant 0 : index
      %c0_13 = arith.constant 0 : index
      %20 = vector.load %arg5[%c0_12, %c0_13] : memref<128x128xbf16, #tpu.memory_space<vmem>>, vector<128x128xbf16>
      %cst_14 = arith.constant dense<0.000000e+00> : vector<8x128xf32>
      %21 = tpu.matmul %19, %20, %cst_14 {dimension_numbers = #tpu.dot_dimension_numbers<[1], [0], [0], [1], [0, 0, 1, 1], [], []>} : vector<8x128xbf16>, vector<128x128xbf16>, vector<8x128xf32> -> vector<8x128xf32>
      %c0_15 = arith.constant 0 : index
      %c0_16 = arith.constant 0 : index
      %22 = vector.load %arg6[%c0_15, %c0_16] : memref<1x128xf32, #tpu.memory_space<vmem>>, vector<1x128xf32>
      %23 = vector.broadcast %22 : vector<1x128xf32> to vector<8x128xf32>
      %24 = arith.addf %21, %23 : vector<8x128xf32>
      %cst_17 = arith.constant 0.000000e+00 : f32
      %25 = vector.broadcast %cst_17 : f32 to vector<8x128xf32>
      %26 = arith.maximumf %24, %25 : vector<8x128xf32>
      %c0_18 = arith.constant 0 : index
      %c0_19 = arith.constant 0 : index
      %27 = vector.load %arg7[%c0_18, %c0_19] : memref<8x128xf32, #tpu.memory_space<vmem>>, vector<8x128xf32>
      tpu.vector_store %arg7[%c0_18, %c0_19], %26 {strides = array<i32>} : memref<8x128xf32, #tpu.memory_space<vmem>>, vector<8x128xf32>,
    } else {
    }
    return
  }
  func.func @transform_0(%arg0: i32, %arg1: i32) -> (i32, i32) {
    %c0_i32 = arith.constant 0 : i32
    return %arg0, %arg1 : i32, i32
  }
  func.func @transform_1(%arg0: i32, %arg1: i32) -> (i32, i32) {
    %c0_i32 = arith.constant 0 : i32
    %c0_i32_0 = arith.constant 0 : i32
    return %arg1, %c0_i32 : i32, i32
  }
  func.func @transform_2(%arg0: i32, %arg1: i32) -> (i32, i32) {
    %c0_i32 = arith.constant 0 : i32
    %c0_i32_0 = arith.constant 0 : i32
    %c0_i32_1 = arith.constant 0 : i32
    return %c0_i32, %c0_i32_0 : i32, i32
  }
  func.func @transform_3(%arg0: i32, %arg1: i32) -> (i32, i32) {
    %c0_i32 = arith.constant 0 : i32
    %c0_i32_0 = arith.constant 0 : i32
    %c0_i32_1 = arith.constant 0 : i32
    return %c0_i32, %c0_i32_0 : i32, i32
  }
  func.func @transform_4(%arg0: i32, %arg1: i32) -> (i32, i32) {
    %c0_i32 = arith.constant 0 : i32
    %c0_i32_0 = arith.constant 0 : i32
    %c0_i32_1 = arith.constant 0 : i32
    return %c0_i32, %c0_i32_0 : i32, i32
  }
  func.func @transform_5(%arg0: i32, %arg1: i32) -> (i32, i32) {
    %c0_i32 = arith.constant 0 : i32
    %c0_i32_0 = arith.constant 0 : i32
    return %arg0, %c0_i32 : i32, i32
  }
}

module attributes {stable_mosaic.version = 11 : i64} {
  func.func @_two_mlp_head_kernel(%arg0: i32, %arg1: i32, %arg2: memref<8x512xf32, #tpu.memory_space<vmem>>, %arg3: memref<512x128xbf16, #tpu.memory_space<vmem>>, %arg4: memref<1x128xf32, #tpu.memory_space<vmem>>, %arg5: memref<128x128xbf16, #tpu.memory_space<vmem>>, %arg6: memref<1x128xf32, #tpu.memory_space<vmem>>, %arg7: memref<8x128xf32, #tpu.memory_space<vmem>>, %arg8: memref<8x128xf32, #tpu.memory_space<vmem>>) attributes {dimension_semantics = [#tpu.dimension_semantics<parallel>, #tpu.dimension_semantics<arbitrary>], iteration_bounds = array<i64: 1, 2>, scalar_prefetch = 0 : i64, scratch_operands = 1 : i64, tpu.core_type = #tpu.core_type<tc>, window_params = [{transform_indices = @transform_0, window_bounds = array<i64: 8, 512>}, {transform_indices = @transform_1, window_bounds = array<i64: 512, 128>}, {pipeline_mode = #tpu.pipeline_mode<synchronous>, transform_indices = @transform_2, window_bounds = array<i64: 1, 128>}, {pipeline_mode = #tpu.pipeline_mode<synchronous>, transform_indices = @transform_3, window_bounds = array<i64: 128, 128>}, {pipeline_mode = #tpu.pipeline_mode<synchronous>, transform_indices = @transform_4, window_bounds = array<i64: 1, 128>}, {transform_indices = @transform_5, window_bounds = array<i64: 8, 128>}]} {
    %c0 = arith.constant 0 : index
    %c0_0 = arith.constant 0 : index
    %0 = vector.load %arg2[%c0, %c0_0] : memref<8x512xf32, #tpu.memory_space<vmem>>, vector<8x512xf32>
    %1 = arith.truncf %0 : vector<8x512xf32> to vector<8x512xbf16>
    %c0_1 = arith.constant 0 : index
    %c0_2 = arith.constant 0 : index
    %2 = vector.load %arg3[%c0_1, %c0_2] : memref<512x128xbf16, #tpu.memory_space<vmem>>, vector<512x128xbf16>
    %cst = arith.constant dense<0.000000e+00> : vector<8x128xf32>
    %3 = tpu.matmul %1, %2, %cst {dimension_numbers = #tpu.dot_dimension_numbers<[1], [0], [0], [1], [0, 0, 1, 1], [], []>} : vector<8x512xbf16>, vector<512x128xbf16>, vector<8x128xf32> -> vector<8x128xf32>
    %c0_i32 = arith.constant 0 : i32
    %4 = arith.cmpi eq, %arg1, %c0_i32 : i32
    %5 = arith.extui %4 : i1 to i32
    %c0_i32_3 = arith.constant 0 : i32
    %6 = arith.cmpi ne, %5, %c0_i32_3 : i32
    scf.if %6 {
      %c0_7 = arith.constant 0 : index
      %c0_8 = arith.constant 0 : index
      %13 = vector.load %arg8[%c0_7, %c0_8] : memref<8x128xf32, #tpu.memory_space<vmem>>, vector<8x128xf32>
      tpu.vector_store %arg8[%c0_7, %c0_8], %3 {strides = array<i32>} : memref<8x128xf32, #tpu.memory_space<vmem>>, vector<8x128xf32>,
    } else {
    }
    %c0_i32_4 = arith.constant 0 : i32
    %7 = arith.cmpi sgt, %arg1, %c0_i32_4 : i32
    %8 = arith.extui %7 : i1 to i32
    %c0_i32_5 = arith.constant 0 : i32
    %9 = arith.cmpi ne, %8, %c0_i32_5 : i32
    scf.if %9 {
      %c0_7 = arith.constant 0 : index
      %c0_8 = arith.constant 0 : index
      %13 = vector.load %arg8[%c0_7, %c0_8] : memref<8x128xf32, #tpu.memory_space<vmem>>, vector<8x128xf32>
      %14 = arith.addf %13, %3 : vector<8x128xf32>
      %c0_9 = arith.constant 0 : index
      %c0_10 = arith.constant 0 : index
      %15 = vector.load %arg8[%c0_9, %c0_10] : memref<8x128xf32, #tpu.memory_space<vmem>>, vector<8x128xf32>
      tpu.vector_store %arg8[%c0_9, %c0_10], %14 {strides = array<i32>} : memref<8x128xf32, #tpu.memory_space<vmem>>, vector<8x128xf32>,
    } else {
    }
    %c1_i32 = arith.constant 1 : i32
    %10 = arith.cmpi eq, %arg1, %c1_i32 : i32
    %11 = arith.extui %10 : i1 to i32
    %c0_i32_6 = arith.constant 0 : i32
    %12 = arith.cmpi ne, %11, %c0_i32_6 : i32
    scf.if %12 {
      %c0_7 = arith.constant 0 : index
      %c0_8 = arith.constant 0 : index
      %13 = vector.load %arg8[%c0_7, %c0_8] : memref<8x128xf32, #tpu.memory_space<vmem>>, vector<8x128xf32>
      %c0_9 = arith.constant 0 : index
      %c0_10 = arith.constant 0 : index
      %14 = vector.load %arg4[%c0_9, %c0_10] : memref<1x128xf32, #tpu.memory_space<vmem>>, vector<1x128xf32>
      %15 = vector.broadcast %14 : vector<1x128xf32> to vector<8x128xf32>
      %16 = arith.addf %13, %15 : vector<8x128xf32>
      %cst_11 = arith.constant 0.000000e+00 : f32
      %17 = vector.broadcast %cst_11 : f32 to vector<8x128xf32>
      %18 = arith.maximumf %16, %17 : vector<8x128xf32>
      %19 = arith.truncf %18 : vector<8x128xf32> to vector<8x128xbf16>
      %c0_12 = arith.constant 0 : index
      %c0_13 = arith.constant 0 : index
      %20 = vector.load %arg5[%c0_12, %c0_13] : memref<128x128xbf16, #tpu.memory_space<vmem>>, vector<128x128xbf16>
      %cst_14 = arith.constant dense<0.000000e+00> : vector<8x128xf32>
      %21 = tpu.matmul %19, %20, %cst_14 {dimension_numbers = #tpu.dot_dimension_numbers<[1], [0], [0], [1], [0, 0, 1, 1], [], []>} : vector<8x128xbf16>, vector<128x128xbf16>, vector<8x128xf32> -> vector<8x128xf32>
      %c0_15 = arith.constant 0 : index
      %c0_16 = arith.constant 0 : index
      %22 = vector.load %arg6[%c0_15, %c0_16] : memref<1x128xf32, #tpu.memory_space<vmem>>, vector<1x128xf32>
      %23 = vector.broadcast %22 : vector<1x128xf32> to vector<8x128xf32>
      %24 = arith.addf %21, %23 : vector<8x128xf32>
      %cst_17 = arith.constant 0.000000e+00 : f32
      %25 = vector.broadcast %cst_17 : f32 to vector<8x128xf32>
      %26 = arith.maximumf %24, %25 : vector<8x128xf32>
      %c0_18 = arith.constant 0 : index
      %c0_19 = arith.constant 0 : index
      %27 = vector.load %arg7[%c0_18, %c0_19] : memref<8x128xf32, #tpu.memory_space<vmem>>, vector<8x128xf32>
      tpu.vector_store %arg7[%c0_18, %c0_19], %26 {strides = array<i32>} : memref<8x128xf32, #tpu.memory_space<vmem>>, vector<8x128xf32>,
    } else {
    }
    return
  }
  func.func @transform_0(%arg0: i32, %arg1: i32) -> (i32, i32) {
    %c0_i32 = arith.constant 0 : i32
    return %arg0, %arg1 : i32, i32
  }
  func.func @transform_1(%arg0: i32, %arg1: i32) -> (i32, i32) {
    %c0_i32 = arith.constant 0 : i32
    %c0_i32_0 = arith.constant 0 : i32
    return %arg1, %c0_i32 : i32, i32
  }
  func.func @transform_2(%arg0: i32, %arg1: i32) -> (i32, i32) {
    %c0_i32 = arith.constant 0 : i32
    %c0_i32_0 = arith.constant 0 : i32
    %c0_i32_1 = arith.constant 0 : i32
    return %c0_i32, %c0_i32_0 : i32, i32
  }
  func.func @transform_3(%arg0: i32, %arg1: i32) -> (i32, i32) {
    %c0_i32 = arith.constant 0 : i32
    %c0_i32_0 = arith.constant 0 : i32
    %c0_i32_1 = arith.constant 0 : i32
    return %c0_i32, %c0_i32_0 : i32, i32
  }
  func.func @transform_4(%arg0: i32, %arg1: i32) -> (i32, i32) {
    %c0_i32 = arith.constant 0 : i32
    %c0_i32_0 = arith.constant 0 : i32
    %c0_i32_1 = arith.constant 0 : i32
    return %c0_i32, %c0_i32_0 : i32, i32
  }
  func.func @transform_5(%arg0: i32, %arg1: i32) -> (i32, i32) {
    %c0_i32 = arith.constant 0 : i32
    %c0_i32_0 = arith.constant 0 : i32
    return %arg0, %c0_i32 : i32, i32
  }
}

</mosaic_0001>

<bundles_post_ra>
// kernel: tpu_custom_call.1
= control target key start
LH: loop header
LB: loop body
LE: loop exit
PB: predicated region body
PF: predicated region fallthrough
CT: control target
= control target key end

     0   :  { %10 = vsyncpa [#allocation4], 0  ;;  %s1683_s0 = inlined_call_operand.hbm [shape: f32[2,1024], index: 0, kind: input, shape index: {}]   ;;  %s1684_s1 = inlined_call_operand.hbm [shape: bf16[1024,128], index: 1, kind: input, shape index: {}]   ;;  %s1685_s2 = inlined_call_operand.vmem [shape: f32[1,128], index: 2, kind: input, shape index: {}]   ;;  %s1686_s3 = inlined_call_operand.hbm [shape: bf16[128,128], index: 3, kind: input, shape index: {}]   ;;  %s1687_s4 = inlined_call_operand.vmem [shape: f32[1,128], index: 4, kind: input, shape index: {}]   ;;  %s1688_s5 = inlined_call_operand.hbm [shape: f32[2,128], index: 5, kind: output, shape index: {}]  }
   0x1   :  { %12 = vsyncpa [#allocation4 + $0x1], 0 }
   0x2   :  { %13 = vsyncpa [#allocation7], 0 }
   0x3   :  { %15 = vsyncpa [#allocation7 + $0x1], 0 }
   0x4   :  { %16 = vsyncpa [#allocation5], 0  ;;  %s1436_s18 = smov 0   ;;  %s1438_s19 = smov 0  }
   0x5   :  { %s1440_s20 = smov 0   ;;  %s1442_s21 = smov 0  }
   0x6   :  { %s1444_s22 = smov 0   ;;  %s1446_s23 = smov 0  }
   0x7 LB: > { %s1465_s24 = sadd.s32 4294967295, %s1388_s23   ;;  %s31_s25 = sadd.s32 1, %s1384_s22  ;;  %s1388_s23 = sphi %s1446_s23, %s22_s23   ;;  %s1384_s22 = sphi %s1444_s22, %s1707_s22   ;;  %s1380_s21 = sphi %s1442_s21, %s1706_s21   ;;  %s1376_s20 = sphi %s1440_s20, %s1705_s20   ;;  %s1372_s19 = sphi %s1438_s19, %s1704_s19   ;;  %s1368_s18 = sphi %s1436_s18, %s1703_s18  }
   0x8   : > { %p32_p0 = scmp.ge.s32.totalorder %s31_s25, 2  ;;  %s43_s26 = sadd.s32 1, %s1376_s20 }
   0x9   : > { %p50_p1 = scmp.ne.s32.totalorder %s1376_s20, %s1372_s19  ;;  %p51_p2 = scmp.eq.s32.totalorder %s1388_s23, 0 }
   0xa   : > { %s1709_s25 = smov (%p32_p0, %s31_s25), 0  ;;  %p56_p4 = scmp.ne.s32.totalorder %s1372_s19, %s1368_s18 }
   0xb   : > { %p1474_p3 = por %p51_p2, %p50_p1  ;;  %s39_s28 = ssub.s32 %s1384_s22, %s1709_s25 }
   0xc   : > { %p1689_p5 = scmp.eq.s32.totalorder %s1465_s24, 0  ;;  %p41_p6 = scmp.eq.s32.totalorder %s39_s28, 0 }
   0xd   : > { %s1693_s27 = scalar_select %p1474_p3, 1, 0 }
   0xe   : > { %p963_p7 = scmp.ge.s32.totalorder %s1388_s23, 1  ;;  %p1485_p8 = por %p1689_p5, %p56_p4 }
   0xf   : > { %p182_p9 = scmp.lt.s32.totalorder %s1388_s23, 3  ;;  %s1390_s7 = smov [#allocation8]  }
  0x10   : > { %s1694_s29 = scalar_select %p1485_p8, 1, 0 }
  0x11   : > { %s1491_s30 = scalar_select %p41_p6, %s1376_s20, %s43_s26  }
  0x12   : > { %p1493_p10 = pnand %p963_p7, %p182_p9  ;;  %s197_s8 = sshll.u32 %s1390_s7, 4  ;;  %s198_s8 = int_to_ptr.vmem [resolvable:$true] %s197_s8 }
  0x13   : > { %s1224_s12 = scalar_lea.hbm %s1686_s3, 1024 }
  0x14   : > { %s1695_s6 = scalar_select %p1493_p10, 1, 0 }
  0x15   : > { %p1109_p11 = pneg %p1493_p10  ;;  %p1225_p13 = scmp.ne.s32.totalorder %s1686_s3, %s1224_s12 }
  0x16   : > { %p1231_p4 = scmp.lt.u32.totalorder %s1224_s12, %s1686_s3 }
  0x17   : > { %p1501_p12 = pnand %p1109_p11, %p1689_p5 }
  0x19   : > { %p1226_p0 = pneg %p1501_p12 }
  0x1b   : > { %p1227_p1 = pnand %p1226_p0, %p1225_p13 }
  0x1d   : > { %p1228_p2 = pneg %p1227_p1 }
  0x1f   : > { %p1233_p6 = pnand %p1231_p4, %p1228_p2 }
  0x21   : > { %1236 = shalt.err (!%p1233_p6)
}
  0x22   : > { %s1237_s17 = scalar_lea.vmem %s198_s8, 1024  ;;  %p1245_p5 = scmp.lt.s32.totalorder %s198_s8, %s198_s8 }
  0x23   : > { %p1238_p7 = scmp.ne.s32.totalorder %s198_s8, %s1237_s17  ;;  %p1246_p8 = scmp.lt.s32.totalorder %s1237_s17, %s1237_s17 }
  0x25   : > { %p1240_p9 = pnand %p1238_p7, %p1226_p0  ;;  %p1247_p10 = por %p1246_p8, %p1245_p5 }
  0x27   : > { %p1241_p11 = pneg %p1240_p9 }
  0x29   : > { %p1248_p3 = pnand %p1247_p10, %p1241_p11 }
  0x2b   : > { %1251 = shalt.err (!%p1248_p3)
}
  0x2c   : > { %s1391_s18 = smov 64   ;;  %s1392_s26 = smov 4  }
  0x2d   : > { %1112 = dma.hbm_to_vmem [thread:$0]  (!%p1501_p12), %s1686_s3, 1024, %s198_s8, [#allocation7], %s1391_s18, %s1391_s18, %s1392_s26  }
  0x2e   : > { %p965_p13 = scmp.ge.s32.totalorder %s1388_s23, 2 }
  0x2f   : > { %p1697_p1 = scmp.ne.s32.totalorder (!%p965_p13), %s1693_s27, 0 }
  0x30   : > { %210 = sbr.rel (%p965_p13) target bundleno = 114 (0x72), region = 28 }
  0x37   : > { %213 = sbr.rel (!%p1697_p1) target bundleno = 87 (0x57), region = 32  ;;  %s214_s10 = sand.u32 (%p1697_p1), 1, %s1376_s20  }
  0x38   : > { %s966_s11 = sshll.u32 (%p1697_p1), %s214_s10, 5  ;;  %s1525_s12 = scalar_lea.sflag (%p1697_p1), [#allocation4], %s214_s10 }
  0x39   : > { %s218_s13 = scalar_lea.vmem (%p1697_p1), [#allocation3], %s966_s11 }
  0x3e   : > { %226 = vsyncadd %s1525_s12, 384  ;;  %s1025_s9 = sshll.u32 %s1384_s22, 7  ;;  %s233_s14 = sshll.u32 %s218_s13, 4  ;;  %s1534_s14 = int_to_ptr.vmem [resolvable:$true] %s233_s14 }
  0x3f   : > { %s1532_s8 = scalar_lea.hbm %s1683_s0, %s1025_s9  ;;  %s1254_s28 = scalar_lea.hbm %s1683_s0, 256 }
  0x40   : > { %s1252_s17 = scalar_lea.hbm %s1532_s8, 128  ;;  %p1255_p5 = scmp.lt.u32.totalorder %s1532_s8, %s1683_s0 }
  0x41   : > { %p1253_p3 = scmp.ne.s32.totalorder %s1532_s8, %s1252_s17  ;;  %p1256_p8 = scmp.lt.u32.totalorder %s1254_s28, %s1252_s17 }
  0x42   : > { %p1258_p12 = scmp.lt.u32.totalorder %s1252_s17, %s1532_s8 }
  0x43   : > { %p1257_p10 = por %p1256_p8, %p1255_p5 }
  0x45   : > { %p1259_p0 = por %p1258_p12, %p1257_p10 }
  0x47   : > { %p1260_p2 = pnand %p1259_p0, %p1253_p3 }
  0x49   : > { %1263 = shalt.err (!%p1260_p2)
}
  0x4a   : > { %s1264_s11 = scalar_lea.vmem %s1534_s14, 128  ;;  %s1393_s13 = smov [#allocation3]  }
  0x4b   : > { %p1265_p4 = scmp.ne.s32.totalorder %s1534_s14, %s1264_s11  ;;  %s1266_s9 = sshll.u32 %s1393_s13, 4  ;;  %s1267_s9 = int_to_ptr.vmem [resolvable:$false] %s1266_s9 }
  0x4c   : > { %s1268_s15 = scalar_lea.vmem %s1267_s9, 1024  ;;  %p1269_p6 = scmp.lt.s32.totalorder %s1534_s14, %s1267_s9 }
  0x4d   : > { %p1270_p7 = scmp.lt.s32.totalorder %s1268_s15, %s1264_s11 }
  0x4f   : > { %p1271_p9 = por %p1270_p7, %p1269_p6 }
  0x51   : > { %p1272_p11 = pnand %p1271_p9, %p1265_p4 }
  0x53   : > { %1275 = shalt.err (!%p1272_p11)
}
  0x54   : > { %s1394_s16 = smov 256   ;;  %s1395_s17 = smov 128  }
  0x55   : > { %s1396_s18 = smov 8  }
  0x56   : > { %239 = dma.hbm_to_vmem [thread:$0]  %s1532_s8, 128, %s1534_s14, %s1525_s12, %s1394_s16, %s1395_s17, %s1396_s18  }
  0x57 PF: > { %s243_s26 = sand.u32 1, %s1388_s23   ;;  %s245_s28 = sand.u32 1, %s1376_s20  }
  0x58   : > { %s969_s7 = sshll.u32 %s245_s28, 8  ;;  %s1026_s10 = sshll.u32 %s1384_s22, 12 }
  0x59   : > { %s1558_s9 = scalar_lea.hbm %s1684_s1, %s1026_s10  ;;  %s247_s15 = scalar_lea.vmem [#allocation6], %s969_s7 }
  0x5a   : > { %s254_s12 = sshll.u32 %s247_s15, 4  ;;  %s1562_s14 = scalar_lea.sflag [#allocation7], %s243_s26  ;;  %s1560_s12 = int_to_ptr.vmem [resolvable:$true] %s254_s12 }
  0x5b   : > { %s1276_s8 = scalar_lea.hbm %s1558_s9, 4096  ;;  %p1698_p1 = scmp.ne.s32.totalorder %s1693_s27, 0 }
  0x5c   : > { %p1277_p13 = scmp.ne.s32.totalorder %s1558_s9, %s1276_s8  ;;  %s1280_s18 = scalar_lea.hbm %s1684_s1, 8192 }
  0x5d   : > { %p1281_p8 = scmp.lt.u32.totalorder %s1558_s9, %s1684_s1  ;;  %p1282_p10 = scmp.lt.u32.totalorder %s1280_s18, %s1276_s8 }
  0x5e   : > { %p1278_p3 = pnand %p1277_p13, %p1698_p1  ;;  %p1284_p0 = scmp.lt.u32.totalorder %s1276_s8, %s1558_s9 }
  0x5f   : > { %p1283_p12 = por %p1282_p10, %p1281_p8 }
  0x60   : > { %p1279_p5 = pneg %p1278_p3 }
  0x61   : > { %p1285_p2 = por %p1284_p0, %p1283_p12 }
  0x63   : > { %p1286_p4 = pnand %p1285_p2, %p1279_p5 }
  0x65   : > { %1289 = shalt.err (!%p1286_p4)
}
  0x66   : > { %s1290_s26 = scalar_lea.vmem %s1560_s12, 4096  ;;  %s1397_s7 = smov [#allocation6]  }
  0x67   : > { %p1291_p6 = scmp.ne.s32.totalorder %s1560_s12, %s1290_s26  ;;  %s1294_s11 = sshll.u32 %s1397_s7, 4  ;;  %s1295_s11 = int_to_ptr.vmem [resolvable:$false] %s1294_s11 }
  0x68   : > { %s1296_s13 = scalar_lea.vmem %s1295_s11, 8192  ;;  %p1297_p11 = scmp.lt.s32.totalorder %s1560_s12, %s1295_s11 }
  0x69   : > { %p1292_p7 = pnand %p1291_p6, %p1698_p1  ;;  %p1298_p13 = scmp.lt.s32.totalorder %s1296_s13, %s1290_s26 }
  0x6b   : > { %p1293_p9 = pneg %p1292_p7  ;;  %p1299_p3 = por %p1298_p13, %p1297_p11 }
  0x6d   : > { %p1300_p8 = pnand %p1299_p3, %p1293_p9 }
  0x6f   : > { %1303 = shalt.err (!%p1300_p8)
}
  0x70   : > { %s1398_s15 = smov 64   ;;  %s1399_s8 = smov 4  }
  0x71   : > { %1102 = dma.hbm_to_vmem [thread:$0]  (%p1698_p1), %s1558_s9, 4096, %s1560_s12, %s1562_s14, %s1398_s15, %s1398_s15, %s1399_s8  }
  0x72 PF: > { %p1699_p5 = scmp.ne.s32.totalorder %s1695_s6, 0 }
  0x73   : > { %s268_s16 = sand.u32 (!%p1699_p5), 1, %s1372_s19   ;;  %p1700_p10 = scmp.ne.s32.totalorder (!%p1699_p5), %s1694_s29, 0 }
  0x74   : > { %266 = sbr.rel (%p1699_p5) target bundleno = 676 (0x2a4), region = 40  ;;  %s973_s17 = sshll.u32 (!%p1699_p5), %s268_s16, 5 }
  0x75   : > { %s269_s18 = scalar_lea.sflag (!%p1699_p5), [#allocation4], %s268_s16  ;;  %s1589_s28 = scalar_lea.vmem (!%p1699_p5), [#allocation3], %s973_s17 }
  0x7b   : > { %1351 = dma.done.wait (%p1700_p10), %s269_s18, 512  }
  0x7c   : > { %1353 = vsyncadd (%p1700_p10), %s269_s18, 4294966784  ;;  %s277_s27 = sand.u32 1, %s1465_s24   ;;  %s974_s9 = sshll.u32 %s268_s16, 8 }
  0x7d   : > { %s278_s12 = scalar_lea.sflag [#allocation7], %s277_s27  ;;  %s1596_s14 = scalar_lea.vmem [#allocation6], %s974_s9 }
  0x7e   : > { %1355 = dma.done.wait (%p1700_p10), %s278_s12, 4096  }
  0x7f   : > { %1357 = vsyncadd (%p1700_p10), %s278_s12, 4294963200  ;;  %p1701_p1 = scmp.eq.s32.totalorder %s1465_s24, 0 }
  0x81   : > { %1359 = dma.done.wait (%p1701_p1), [#allocation7], 1024   ;;  %p1702_p12 = pmov %p1701_p1 }
  0x82   : > { %v1178_v0 = vld [vmem:[%s1596_s14 + $0x40] sm:$0xff]   ;;  %v1182_v4 = vld [vmem:[%s1596_s14 + $0x48] sm:$0xff]   ;;  %v1186_v8 = vld [vmem:[%s1596_s14 + $0x50] sm:$0xff]   ;;  %v1400_v24 = vmov 1983009808   ;;  %v337_v26 = vlaneseq  ;;  %p1008_p0 = scmp.ne.s32.totalorder %s1380_s21, 0 }
  0x83   : > { %1361 = vsyncadd (%p1702_p12), [#allocation7], 4294966272  ;;  %v1179_v1 = vld [vmem:[%s1596_s14 + $0xc0] sm:$0xff]   ;;  %1027 = vmatprep.subr.bf16.mxu0 %v1178_v0  ;;  %v1183_v5 = vld [vmem:[%s1596_s14 + $0xc8] sm:$0xff]   ;;  %v335_v25 = vunpack.c.l.s4 %v1400_v24 }
  0x84   : > { %v1180_v2 = vld [vmem:[%s1596_s14] sm:$0xff]   ;;  %1049 = vmatprep.subr.bf16.mxu1 %v1179_v1  ;;  %v1184_v6 = vld [vmem:[%s1596_s14 + $0x8] sm:$0xff]   ;;  %v1187_v9 = vld [vmem:[%s1596_s14 + $0xd0] sm:$0xff]   ;;  %v338_v32 = vshrl.u32 %v337_v26, 7 }
  0x85   : > { %v1181_v3 = vld [vmem:[%s1596_s14 + $0x80] sm:$0xff]   ;;  %1028 = vmatpush3.bf16.msra.mxu0 %v1180_v2  ;;  %v1185_v7 = vld [vmem:[%s1596_s14 + $0x88] sm:$0xff]   ;;  %v1188_v10 = vld [vmem:[%s1596_s14 + $0x10] sm:$0xff]   ;;  %v336_v31 = vunpack.c.0.s8 %v335_v25 }
  0x86   : > { %1050 = vmatpush3.bf16.msra.mxu1 %v1181_v3  ;;  %1029 = vmatprep.subr.bf16.mxu0 %v1182_v4  ;;  %v1189_v11 = vld [vmem:[%s1596_s14 + $0x90] sm:$0xff]   ;;  %v1190_v12 = vld [vmem:[%s1596_s14 + $0x58] sm:$0xff]   ;;  %v1194_v16 = vld [vmem:[%s1596_s14 + $0x60] sm:$0xff]  }
  0x87   : > { %1051 = vmatprep.subr.bf16.mxu1 %v1183_v5  ;;  %v1191_v13 = vld [vmem:[%s1596_s14 + $0xd8] sm:$0xff]   ;;  %v1195_v17 = vld [vmem:[%s1596_s14 + $0xe0] sm:$0xff]   ;;  %v1198_v20 = vld [vmem:[%s1596_s14 + $0x68] sm:$0xff]   ;;  %v339_v37 = vsub.s32 %v336_v31, %v338_v32 }
  0x88   : > { %v1192_v14 = vld [vmem:[%s1596_s14 + $0x18] sm:$0xff]   ;;  %v1196_v18 = vld [vmem:[%s1596_s14 + $0x20] sm:$0xff]   ;;  %v1199_v21 = vld [vmem:[%s1596_s14 + $0xe8] sm:$0xff]  }
  0x89   : > { %1030 = vmatpush3.bf16.msra.mxu0 %v1184_v6  ;;  %v1193_v15 = vld [vmem:[%s1596_s14 + $0x98] sm:$0xff]   ;;  %v1197_v19 = vld [vmem:[%s1596_s14 + $0xa0] sm:$0xff]   ;;  %v1200_v22 = vld [vmem:[%s1596_s14 + $0x28] sm:$0xff]  }
  0x8a   : > { %1052 = vmatpush3.bf16.msra.mxu1 %v1185_v7  ;;  %1031 = vmatprep.subr.bf16.mxu0 %v1186_v8  ;;  %v1201_v23 = vld [vmem:[%s1596_s14 + $0xa8] sm:$0xff]   ;;  %v1202_v27 = vld [vmem:[%s1596_s14 + $0x70] sm:$0xff]   ;;  %v1206_v33 = vld [vmem:[%s1596_s14 + $0x78] sm:$0xff]  }
  0x8b   : > { %1053 = vmatprep.subr.bf16.mxu1 %v1187_v9  ;;  %v1203_v28 = vld [vmem:[%s1596_s14 + $0xf0] sm:$0xff]   ;;  %v1207_v34 = vld [vmem:[%s1596_s14 + $0xf8] sm:$0xff]   ;;  %v1210_v38 = vld [vmem:[%s1589_s28] ss:$8 sps:$4 sm:$0xff]  }
  0x8c   : > { %v1204_v29 = vld [vmem:[%s1596_s14 + $0x30] sm:$0xff]   ;;  %v1208_v35 = vld [vmem:[%s1596_s14 + $0x38] sm:$0xff]   ;;  %v1214_v40 = vld [vmem:[%s1589_s28 + $0x4] ss:$8 sps:$4 sm:$0xff]   ;;  %v340_v42 = vrot.slane %v1210_v38, %v339_v37 }
  0x8d   : > { %1032 = vmatpush3.bf16.msra.mxu0 %v1188_v10  ;;  %v1205_v30 = vld [vmem:[%s1596_s14 + $0xb0] sm:$0xff]   ;;  %v1209_v36 = vld [vmem:[%s1596_s14 + $0xb8] sm:$0xff]   ;;  %v347_v44 = vrot.slane %v1214_v40, %v339_v37 }
  0x8e   : > { %1054 = vmatpush3.bf16.msra.mxu1 %v1189_v11  ;;  %1033 = vmatprep.subr.bf16.mxu0 %v1190_v12  ;;  %v1212_v39 = vld [vmem:[%s1589_s28 + $0x10] ss:$8 sps:$4 sm:$0xff]   ;;  %v1215_v41 = vld [vmem:[%s1589_s28 + $0x14] ss:$8 sps:$4 sm:$0xff]  }
  0x8f   : > { %1055 = vmatprep.subr.bf16.mxu1 %v1191_v13  ;;  %v354_v43 = vrot.slane %v1212_v39, %v339_v37  ;;  %v361_v45 = vrot.slane %v1215_v41, %v339_v37 }
  0x91   : > { %1034 = vmatpush3.bf16.msra.mxu0 %v1192_v14  ;;  %v363_v46 = vcombine.high %v340_v42, %v354_v43  ;;  %v362_v47 = vcombine.low %v340_v42, %v354_v43  ;;  %v365_v48 = vcombine.high %v347_v44, %v361_v45  ;;  %v364_v49 = vcombine.low %v347_v44, %v361_v45 }
  0x92   : > { %1056 = vmatpush3.bf16.msra.mxu1 %v1193_v15  ;;  %1035 = vmatprep.subr.bf16.mxu0 %v1194_v16 }
  0x93   : > { %1057 = vmatprep.subr.bf16.mxu1 %v1195_v17  ;;  %v371_v50 = vpack.c.bf16 %v363_v46, %v363_v46  ;;  %v370_v51 = vpack.c.bf16 %v362_v47, %v362_v47  ;;  %v373_v52 = vpack.c.bf16 %v365_v48, %v365_v48  ;;  %v372_v53 = vpack.c.bf16 %v364_v49, %v364_v49 }
  0x95   : > { %1036 = vmatpush3.bf16.msra.mxu0 %v1196_v18  ;;  %662 = vmatprep.mubr.bf16.mxu0 %v371_v50 }
  0x96   : > { %1058 = vmatpush3.bf16.msra.mxu1 %v1197_v19  ;;  %1037 = vmatprep.subr.bf16.mxu0 %v1198_v20 }
  0x97   : > { %1059 = vmatprep.subr.bf16.mxu1 %v1199_v21  ;;  %702 = vmatprep.mubr.bf16.mxu1 %v373_v52 }
  0x99   : > { %1038 = vmatpush3.bf16.msra.mxu0 %v1200_v22 }
  0x9a   : > { %1060 = vmatpush3.bf16.msra.mxu1 %v1201_v23  ;;  %1039 = vmatprep.subr.bf16.mxu0 %v1202_v27 }
  0x9b   : > { %1061 = vmatprep.subr.bf16.mxu1 %v1203_v28 }
  0x9d   : > { %1040 = vmatpush3.bf16.msra.mxu0 %v1204_v29 }
  0x9e   : > { %1062 = vmatpush3.bf16.msra.mxu1 %v1205_v30  ;;  %1041 = vmatprep.subr.bf16.mxu0 %v1206_v33 }
  0x9f   : > { %1063 = vmatprep.subr.bf16.mxu1 %v1207_v34 }
  0xa1   : > { %1042 = vmatpush3.bf16.msra.mxu0 %v1208_v35 }
  0xa2   : > { %1064 = vmatpush3.bf16.msra.mxu1 %v1209_v36 }
  0xa4   : > { %663 = vmatmul.mubr.bf16.vlgmr.msra.gmra.mrb[0].mxu0 %v370_v51 }
  0xa5   : > { %703 = vmatmul.mubr.bf16.vlgmr.msra.gmra.mrb[0].mxu1 %v372_v53 }
 0x176   : > { %713 = sbr.rel (%p1008_p0) target bundleno = 383 (0x17f), region = 56 }
 0x177   : > { %v1043_v54 = vpop.f32.mrb[0].mxu0 }
 0x178   : > { %v1065_v55 = vpop.f32.mrb[0].mxu1  ;;  %v1044_v56 = vpop.f32.mrb[1].mxu0 }
 0x179   : > { %v1045_v57 = vadd.f32 %v1044_v56, %v1043_v54  ;;  %v1066_v58 = vpop.f32.mrb[1].mxu1  ;;  %v1046_v59 = vpop.f32.mrb[2].mxu0 }
 0x17a   : > { %v1067_v60 = vadd.f32 %v1066_v58, %v1065_v55  ;;  %v1068_v61 = vpop.f32.mrb[2].mxu1  ;;  %v1047_v62 = vpop.f32.mrb[3].mxu0 }
 0x17b   : > { %v1069_v63 = vpop.f32.mrb[3].mxu1 }
 0x17c   : > { %v705_v0 = vadd.f32 %v1067_v60, %v1045_v57 }
 0x17e   : > { %714 = vst [vmem:[#allocation2] sm:$0xff] %v705_v0 }
 0x17f PF: > { %p1009_p2 = scmp.le.s32.totalorder %s1380_s21, 0 }
 0x181   : > { %718 = sbr.rel (%p1009_p2) target bundleno = 393 (0x189), region = 60 }
 0x185   : > { %v719_v1 = vld [vmem:[#allocation2] sm:$0xff] (!%p1009_p2) }
 0x186   : > { %v720_v2 = vadd.f32 (!%p1009_p2), %v719_v1, %v705_v0 }
 0x188   : > { %721 = vst [vmem:[#allocation2] sm:$0xff] %v720_v2 }
 0x189 PF: > { %p1010_p4 = scmp.ne.s32.totalorder %s1380_s21, 1 }
 0x18a   : > { %v1216_v3 = vld [vmem:[#allocation8] sm:$0xff] (!%p1010_p4)   ;;  %v1401_v4 = vmov (!%p1010_p4), 0.0   ;;  %v1217_v5 = vld [vmem:[#allocation8 + $0x8] sm:$0xff] (!%p1010_p4)   ;;  %vm1402_vm0 = vmmov (!%p1010_p4), 0   ;;  %v1218_v6 = vld [vmem:[#allocation8 + $0x10] sm:$0xff] (!%p1010_p4)  }
 0x18b   : > { %725 = sbr.rel (%p1010_p4) target bundleno = 644 (0x284), region = 64  ;;  %1080 = vmatprep.subr.bf16.mxu0 (!%p1010_p4), %v1401_v4  ;;  %1096 = vmatprep.mubr.msk.bf16.mxu0 (!%p1010_p4), %vm1402_vm0, %v1401_v4  ;;  %v1219_v7 = vld [vmem:[#allocation8 + $0x18] sm:$0xff] (!%p1010_p4)   ;;  %v1220_v8 = vld [vmem:[#allocation8 + $0x20] sm:$0xff] (!%p1010_p4)   ;;  %v1221_v9 = vld [vmem:[#allocation8 + $0x28] sm:$0xff] (!%p1010_p4)  }
 0x18c   : > { %1081 = vmatpush3.bf16.msra.mxu0 (!%p1010_p4), %v1216_v3  ;;  %v1011_v11 = vld [vmem:[%s1685_s2] ss:$0 sm:$0xff] (!%p1010_p4)  ;;  %v1222_v13 = vld [vmem:[#allocation8 + $0x30] sm:$0xff] (!%p1010_p4)  }
 0x18d   : > { %1082 = vmatprep.subr.bf16.mxu0 (!%p1010_p4), %v1401_v4  ;;  %v1223_v15 = vld [vmem:[#allocation8 + $0x38] sm:$0xff] (!%p1010_p4)  }
 0x18e   : > { %v1012_v17 = vld [vmem:[%s1687_s4] ss:$0 sm:$0xff] (!%p1010_p4) }
 0x18f   : > { %v726_v10 = vld [vmem:[#allocation2] sm:$0xff] (!%p1010_p4) }
 0x190   : > { %1083 = vmatpush3.bf16.msra.mxu0 (!%p1010_p4), %v1217_v5  ;;  %v734_v12 = vadd.f32 (!%p1010_p4), %v1011_v11, %v726_v10 }
 0x191   : > { %1084 = vmatprep.subr.bf16.mxu0 (!%p1010_p4), %v1401_v4 }
 0x192   : > { %v735_v14 = vmax.f32 %v734_v12, 0.0 }
 0x194   : > { %1085 = vmatpush3.bf16.msra.mxu0 %v1218_v6  ;;  %v736_v16 = vpack.c.bf16 %v735_v14, %v735_v14 }
 0x195   : > { %1086 = vmatprep.subr.bf16.mxu0 %v1401_v4 }
 0x198   : > { %1087 = vmatpush3.bf16.msra.mxu0 %v1219_v7 }
 0x199   : > { %1088 = vmatprep.subr.bf16.mxu0 %v1401_v4 }
 0x19c   : > { %1089 = vmatpush3.bf16.msra.mxu0 %v1220_v8 }
 0x19d   : > { %1090 = vmatprep.subr.bf16.mxu0 %v1401_v4 }
 0x1a0   : > { %1091 = vmatpush3.bf16.msra.mxu0 %v1221_v9 }
 0x1a1   : > { %1092 = vmatprep.subr.bf16.mxu0 %v1401_v4 }
 0x1a4   : > { %1093 = vmatpush3.bf16.msra.mxu0 %v1222_v13 }
 0x1a5   : > { %1094 = vmatprep.subr.bf16.mxu0 %v1401_v4 }
 0x1a8   : > { %1095 = vmatpush3.bf16.msra.mxu0 %v1223_v15 }
 0x1ab   : > { %1097 = vmatmul.mubr.bf16.vlgmr.msra.gmra.mrb[0].mxu0 %v736_v16 }
 0x27e   : > { %v842_v18 = vpop.f32.mrb[0].mxu0 }
 0x27f   : > { %v843_v19 = vadd.f32 %v1012_v17, %v842_v18  ;;  %v1098_v20 = vpop.f32.mrb[1].mxu0 }
 0x280   : > { %v845_v21 = vpop.f32.mrb[2].mxu0 }
 0x281   : > { %v848_v22 = vmax.f32 %v843_v19, 0.0  ;;  %v1099_v23 = vpop.f32.mrb[3].mxu0 }
 0x283   : > { %849 = vst [vmem:[#allocation9] sm:$0xff] %v848_v22 }
 0x284 PF: > { %p1021_p6 = scmp.ne.s32.totalorder %s1465_s24, 1 }
 0x286   : > { %852 = sbr.rel (%p1021_p6) target bundleno = 672 (0x2a0), region = 68 }
 0x28d   : > { %858 = vsyncadd [#allocation5], 96  ;;  %s1403_s26 = smov [#allocation9]  }
 0x28e   : > { %s863_s7 = sshll.u32 %s1403_s26, 4  ;;  %s864_s7 = int_to_ptr.vmem [resolvable:$true] %s863_s7 }
 0x28f   : > { %s1304_s11 = scalar_lea.vmem %s864_s7, 32  ;;  %s1308_s13 = scalar_lea.vmem %s864_s7, 128 }
 0x290   : > { %p1305_p7 = scmp.ne.s32.totalorder %s864_s7, %s1304_s11  ;;  %p1309_p9 = scmp.lt.s32.totalorder %s864_s7, %s864_s7 }
 0x291   : > { %p1310_p11 = scmp.lt.s32.totalorder %s1308_s13, %s1304_s11 }
 0x293   : > { %p1311_p13 = por %p1310_p11, %p1309_p9 }
 0x295   : > { %p1312_p3 = pnand %p1311_p13, %p1305_p7 }
 0x297   : > { %1315 = shalt.err (!%p1312_p3)
}
 0x298   : > { %s1316_s16 = scalar_lea.hbm %s1688_s5, 32 }
 0x299   : > { %p1317_p8 = scmp.ne.s32.totalorder %s1688_s5, %s1316_s16  ;;  %p1320_p5 = scmp.lt.u32.totalorder %s1316_s16, %s1688_s5 }
 0x29b   : > { %p1322_p10 = pnand %p1320_p5, %p1317_p8 }
 0x29d   : > { %1325 = shalt.err (!%p1322_p10)
}
 0x29e   : > { %s1404_s9 = smov 32   ;;  %s1405_s12 = smov 2  }
 0x29f   : > { %869 = dma.vmem_to_hbm [thread:$0]  %s864_s7, 32, %s1688_s5, [#allocation5], %s1404_s9, %s1404_s9, %s1405_s12  }
 0x2a0 PF: > { %p1115_p1 = scmp.eq.s32.totalorder %s1465_s24, 1 }
 0x2a2   : > { %1363 = dma.done.wait (%p1115_p1), [#allocation5], 128  }
 0x2a3   : > { %1365 = vsyncadd (%p1115_p1), [#allocation5], 4294967168 }
 0x2a4 PF: > { %s22_s23 = sadd.s32 1, %s1388_s23   ;;  %s1703_s18 = smov %s1372_s19 }
 0x2a5   : > { %p19_p12 = scmp.ge.s32.totalorder %s22_s23, 4   ;;  %s1704_s19 = smov %s1376_s20 }
 0x2a6   : > { %s1705_s20 = smov %s1491_s30  ;;  %s1706_s21 = smov %s1384_s22 }
 0x2a7   : > { %s1707_s22 = smov %s1709_s25  ;;  %21 = sbr.rel (!%p19_p12) target bundleno = 7 (0x7), region = 107 }
 0x2ae   :  { %879 = vsyncpa [#allocation4], 1 }
 0x2af   :  { %881 = vsyncpa [#allocation4 + $0x1], 1 }
 0x2b0   :  { %882 = vsyncpa [#allocation7], 1 }
 0x2b1   :  { %884 = vsyncpa [#allocation7 + $0x1], 1 }
 0x2b2   :  { %885 = vsyncpa [#allocation5], 1 }
 0x2b3   :  { %887 = vsyncpa [#allocation5 + $0x1], 1 }

// kernel: tpu_custom_call.1
= control target key start
LH: loop header
LB: loop body
LE: loop exit
PB: predicated region body
PF: predicated region fallthrough
CT: control target
= control target key end

     0   :  { %10 = vsyncpa [#allocation4], 0  ;;  %s1683_s0 = inlined_call_operand.hbm [shape: f32[2,1024], index: 0, kind: input, shape index: {}]   ;;  %s1684_s1 = inlined_call_operand.hbm [shape: bf16[1024,128], index: 1, kind: input, shape index: {}]   ;;  %s1685_s2 = inlined_call_operand.vmem [shape: f32[1,128], index: 2, kind: input, shape index: {}]   ;;  %s1686_s3 = inlined_call_operand.hbm [shape: bf16[128,128], index: 3, kind: input, shape index: {}]   ;;  %s1687_s4 = inlined_call_operand.vmem [shape: f32[1,128], index: 4, kind: input, shape index: {}]   ;;  %s1688_s5 = inlined_call_operand.hbm [shape: f32[2,128], index: 5, kind: output, shape index: {}]  }
   0x1   :  { %12 = vsyncpa [#allocation4 + $0x1], 0 }
   0x2   :  { %13 = vsyncpa [#allocation7], 0 }
   0x3   :  { %15 = vsyncpa [#allocation7 + $0x1], 0 }
   0x4   :  { %16 = vsyncpa [#allocation5], 0  ;;  %s1436_s18 = smov 0   ;;  %s1438_s19 = smov 0  }
   0x5   :  { %s1440_s20 = smov 0   ;;  %s1442_s21 = smov 0  }
   0x6   :  { %s1444_s22 = smov 0   ;;  %s1446_s23 = smov 0  }
   0x7 LB: > { %s1465_s24 = sadd.s32 4294967295, %s1388_s23   ;;  %s31_s25 = sadd.s32 1, %s1384_s22  ;;  %s1388_s23 = sphi %s1446_s23, %s22_s23   ;;  %s1384_s22 = sphi %s1444_s22, %s1707_s22   ;;  %s1380_s21 = sphi %s1442_s21, %s1706_s21   ;;  %s1376_s20 = sphi %s1440_s20, %s1705_s20   ;;  %s1372_s19 = sphi %s1438_s19, %s1704_s19   ;;  %s1368_s18 = sphi %s1436_s18, %s1703_s18  }
   0x8   : > { %p32_p0 = scmp.ge.s32.totalorder %s31_s25, 2  ;;  %s43_s26 = sadd.s32 1, %s1376_s20 }
   0x9   : > { %p50_p1 = scmp.ne.s32.totalorder %s1376_s20, %s1372_s19  ;;  %p51_p2 = scmp.eq.s32.totalorder %s1388_s23, 0 }
   0xa   : > { %s1709_s25 = smov (%p32_p0, %s31_s25), 0  ;;  %p56_p4 = scmp.ne.s32.totalorder %s1372_s19, %s1368_s18 }
   0xb   : > { %p1474_p3 = por %p51_p2, %p50_p1  ;;  %s39_s28 = ssub.s32 %s1384_s22, %s1709_s25 }
   0xc   : > { %p1689_p5 = scmp.eq.s32.totalorder %s1465_s24, 0  ;;  %p41_p6 = scmp.eq.s32.totalorder %s39_s28, 0 }
   0xd   : > { %s1693_s27 = scalar_select %p1474_p3, 1, 0 }
   0xe   : > { %p963_p7 = scmp.ge.s32.totalorder %s1388_s23, 1  ;;  %p1485_p8 = por %p1689_p5, %p56_p4 }
   0xf   : > { %p182_p9 = scmp.lt.s32.totalorder %s1388_s23, 3  ;;  %s1390_s7 = smov [#allocation8]  }
  0x10   : > { %s1694_s29 = scalar_select %p1485_p8, 1, 0 }
  0x11   : > { %s1491_s30 = scalar_select %p41_p6, %s1376_s20, %s43_s26  }
  0x12   : > { %p1493_p10 = pnand %p963_p7, %p182_p9  ;;  %s197_s8 = sshll.u32 %s1390_s7, 4  ;;  %s198_s8 = int_to_ptr.vmem [resolvable:$true] %s197_s8 }
  0x13   : > { %s1224_s12 = scalar_lea.hbm %s1686_s3, 1024 }
  0x14   : > { %s1695_s6 = scalar_select %p1493_p10, 1, 0 }
  0x15   : > { %p1109_p11 = pneg %p1493_p10  ;;  %p1225_p13 = scmp.ne.s32.totalorder %s1686_s3, %s1224_s12 }
  0x16   : > { %p1231_p4 = scmp.lt.u32.totalorder %s1224_s12, %s1686_s3 }
  0x17   : > { %p1501_p12 = pnand %p1109_p11, %p1689_p5 }
  0x19   : > { %p1226_p0 = pneg %p1501_p12 }
  0x1b   : > { %p1227_p1 = pnand %p1226_p0, %p1225_p13 }
  0x1d   : > { %p1228_p2 = pneg %p1227_p1 }
  0x1f   : > { %p1233_p6 = pnand %p1231_p4, %p1228_p2 }
  0x21   : > { %1236 = shalt.err (!%p1233_p6)
}
  0x22   : > { %s1237_s17 = scalar_lea.vmem %s198_s8, 1024  ;;  %p1245_p5 = scmp.lt.s32.totalorder %s198_s8, %s198_s8 }
  0x23   : > { %p1238_p7 = scmp.ne.s32.totalorder %s198_s8, %s1237_s17  ;;  %p1246_p8 = scmp.lt.s32.totalorder %s1237_s17, %s1237_s17 }
  0x25   : > { %p1240_p9 = pnand %p1238_p7, %p1226_p0  ;;  %p1247_p10 = por %p1246_p8, %p1245_p5 }
  0x27   : > { %p1241_p11 = pneg %p1240_p9 }
  0x29   : > { %p1248_p3 = pnand %p1247_p10, %p1241_p11 }
  0x2b   : > { %1251 = shalt.err (!%p1248_p3)
}
  0x2c   : > { %s1391_s18 = smov 64   ;;  %s1392_s26 = smov 4  }
  0x2d   : > { %1112 = dma.hbm_to_vmem [thread:$0]  (!%p1501_p12), %s1686_s3, 1024, %s198_s8, [#allocation7], %s1391_s18, %s1391_s18, %s1392_s26  }
  0x2e   : > { %p965_p13 = scmp.ge.s32.totalorder %s1388_s23, 2 }
  0x2f   : > { %p1697_p1 = scmp.ne.s32.totalorder (!%p965_p13), %s1693_s27, 0 }
  0x30   : > { %210 = sbr.rel (%p965_p13) target bundleno = 114 (0x72), region = 28 }
  0x37   : > { %213 = sbr.rel (!%p1697_p1) target bundleno = 87 (0x57), region = 32  ;;  %s214_s10 = sand.u32 (%p1697_p1), 1, %s1376_s20  }
  0x38   : > { %s966_s11 = sshll.u32 (%p1697_p1), %s214_s10, 5  ;;  %s1525_s12 = scalar_lea.sflag (%p1697_p1), [#allocation4], %s214_s10 }
  0x39   : > { %s218_s13 = scalar_lea.vmem (%p1697_p1), [#allocation3], %s966_s11 }
  0x3e   : > { %226 = vsyncadd %s1525_s12, 384  ;;  %s1025_s9 = sshll.u32 %s1384_s22, 7  ;;  %s233_s14 = sshll.u32 %s218_s13, 4  ;;  %s1534_s14 = int_to_ptr.vmem [resolvable:$true] %s233_s14 }
  0x3f   : > { %s1532_s8 = scalar_lea.hbm %s1683_s0, %s1025_s9  ;;  %s1254_s28 = scalar_lea.hbm %s1683_s0, 256 }
  0x40   : > { %s1252_s17 = scalar_lea.hbm %s1532_s8, 128  ;;  %p1255_p5 = scmp.lt.u32.totalorder %s1532_s8, %s1683_s0 }
  0x41   : > { %p1253_p3 = scmp.ne.s32.totalorder %s1532_s8, %s1252_s17  ;;  %p1256_p8 = scmp.lt.u32.totalorder %s1254_s28, %s1252_s17 }
  0x42   : > { %p1258_p12 = scmp.lt.u32.totalorder %s1252_s17, %s1532_s8 }
  0x43   : > { %p1257_p10 = por %p1256_p8, %p1255_p5 }
  0x45   : > { %p1259_p0 = por %p1258_p12, %p1257_p10 }
  0x47   : > { %p1260_p2 = pnand %p1259_p0, %p1253_p3 }
  0x49   : > { %1263 = shalt.err (!%p1260_p2)
}
  0x4a   : > { %s1264_s11 = scalar_lea.vmem %s1534_s14, 128  ;;  %s1393_s13 = smov [#allocation3]  }
  0x4b   : > { %p1265_p4 = scmp.ne.s32.totalorder %s1534_s14, %s1264_s11  ;;  %s1266_s9 = sshll.u32 %s1393_s13, 4  ;;  %s1267_s9 = int_to_ptr.vmem [resolvable:$false] %s1266_s9 }
  0x4c   : > { %s1268_s15 = scalar_lea.vmem %s1267_s9, 1024  ;;  %p1269_p6 = scmp.lt.s32.totalorder %s1534_s14, %s1267_s9 }
  0x4d   : > { %p1270_p7 = scmp.lt.s32.totalorder %s1268_s15, %s1264_s11 }
  0x4f   : > { %p1271_p9 = por %p1270_p7, %p1269_p6 }
  0x51   : > { %p1272_p11 = pnand %p1271_p9, %p1265_p4 }
  0x53   : > { %1275 = shalt.err (!%p1272_p11)
}
  0x54   : > { %s1394_s16 = smov 256   ;;  %s1395_s17 = smov 128  }
  0x55   : > { %s1396_s18 = smov 8  }
  0x56   : > { %239 = dma.hbm_to_vmem [thread:$0]  %s1532_s8, 128, %s1534_s14, %s1525_s12, %s1394_s16, %s1395_s17, %s1396_s18  }
  0x57 PF: > { %s243_s26 = sand.u32 1, %s1388_s23   ;;  %s245_s28 = sand.u32 1, %s1376_s20  }
  0x58   : > { %s969_s7 = sshll.u32 %s245_s28, 8  ;;  %s1026_s10 = sshll.u32 %s1384_s22, 12 }
  0x59   : > { %s1558_s9 = scalar_lea.hbm %s1684_s1, %s1026_s10  ;;  %s247_s15 = scalar_lea.vmem [#allocation6], %s969_s7 }
  0x5a   : > { %s254_s12 = sshll.u32 %s247_s15, 4  ;;  %s1562_s14 = scalar_lea.sflag [#allocation7], %s243_s26  ;;  %s1560_s12 = int_to_ptr.vmem [resolvable:$true] %s254_s12 }
  0x5b   : > { %s1276_s8 = scalar_lea.hbm %s1558_s9, 4096  ;;  %p1698_p1 = scmp.ne.s32.totalorder %s1693_s27, 0 }
  0x5c   : > { %p1277_p13 = scmp.ne.s32.totalorder %s1558_s9, %s1276_s8  ;;  %s1280_s18 = scalar_lea.hbm %s1684_s1, 8192 }
  0x5d   : > { %p1281_p8 = scmp.lt.u32.totalorder %s1558_s9, %s1684_s1  ;;  %p1282_p10 = scmp.lt.u32.totalorder %s1280_s18, %s1276_s8 }
  0x5e   : > { %p1278_p3 = pnand %p1277_p13, %p1698_p1  ;;  %p1284_p0 = scmp.lt.u32.totalorder %s1276_s8, %s1558_s9 }
  0x5f   : > { %p1283_p12 = por %p1282_p10, %p1281_p8 }
  0x60   : > { %p1279_p5 = pneg %p1278_p3 }
  0x61   : > { %p1285_p2 = por %p1284_p0, %p1283_p12 }
  0x63   : > { %p1286_p4 = pnand %p1285_p2, %p1279_p5 }
  0x65   : > { %1289 = shalt.err (!%p1286_p4)
}
  0x66   : > { %s1290_s26 = scalar_lea.vmem %s1560_s12, 4096  ;;  %s1397_s7 = smov [#allocation6]  }
  0x67   : > { %p1291_p6 = scmp.ne.s32.totalorder %s1560_s12, %s1290_s26  ;;  %s1294_s11 = sshll.u32 %s1397_s7, 4  ;;  %s1295_s11 = int_to_ptr.vmem [resolvable:$false] %s1294_s11 }
  0x68   : > { %s1296_s13 = scalar_lea.vmem %s1295_s11, 8192  ;;  %p1297_p11 = scmp.lt.s32.totalorder %s1560_s12, %s1295_s11 }
  0x69   : > { %p1292_p7 = pnand %p1291_p6, %p1698_p1  ;;  %p1298_p13 = scmp.lt.s32.totalorder %s1296_s13, %s1290_s26 }
  0x6b   : > { %p1293_p9 = pneg %p1292_p7  ;;  %p1299_p3 = por %p1298_p13, %p1297_p11 }
  0x6d   : > { %p1300_p8 = pnand %p1299_p3, %p1293_p9 }
  0x6f   : > { %1303 = shalt.err (!%p1300_p8)
}
  0x70   : > { %s1398_s15 = smov 64   ;;  %s1399_s8 = smov 4  }
  0x71   : > { %1102 = dma.hbm_to_vmem [thread:$0]  (%p1698_p1), %s1558_s9, 4096, %s1560_s12, %s1562_s14, %s1398_s15, %s1398_s15, %s1399_s8  }
  0x72 PF: > { %p1699_p5 = scmp.ne.s32.totalorder %s1695_s6, 0 }
  0x73   : > { %s268_s16 = sand.u32 (!%p1699_p5), 1, %s1372_s19   ;;  %p1700_p10 = scmp.ne.s32.totalorder (!%p1699_p5), %s1694_s29, 0 }
  0x74   : > { %266 = sbr.rel (%p1699_p5) target bundleno = 676 (0x2a4), region = 40  ;;  %s973_s17 = sshll.u32 (!%p1699_p5), %s268_s16, 5 }
  0x75   : > { %s269_s18 = scalar_lea.sflag (!%p1699_p5), [#allocation4], %s268_s16  ;;  %s1589_s28 = scalar_lea.vmem (!%p1699_p5), [#allocation3], %s973_s17 }
  0x7b   : > { %1351 = dma.done.wait (%p1700_p10), %s269_s18, 512  }
  0x7c   : > { %1353 = vsyncadd (%p1700_p10), %s269_s18, 4294966784  ;;  %s277_s27 = sand.u32 1, %s1465_s24   ;;  %s974_s9 = sshll.u32 %s268_s16, 8 }
  0x7d   : > { %s278_s12 = scalar_lea.sflag [#allocation7], %s277_s27  ;;  %s1596_s14 = scalar_lea.vmem [#allocation6], %s974_s9 }
  0x7e   : > { %1355 = dma.done.wait (%p1700_p10), %s278_s12, 4096  }
  0x7f   : > { %1357 = vsyncadd (%p1700_p10), %s278_s12, 4294963200  ;;  %p1701_p1 = scmp.eq.s32.totalorder %s1465_s24, 0 }
  0x81   : > { %1359 = dma.done.wait (%p1701_p1), [#allocation7], 1024   ;;  %p1702_p12 = pmov %p1701_p1 }
  0x82   : > { %v1178_v0 = vld [vmem:[%s1596_s14 + $0x40] sm:$0xff]   ;;  %v1182_v4 = vld [vmem:[%s1596_s14 + $0x48] sm:$0xff]   ;;  %v1186_v8 = vld [vmem:[%s1596_s14 + $0x50] sm:$0xff]   ;;  %v1400_v24 = vmov 1983009808   ;;  %v337_v26 = vlaneseq  ;;  %p1008_p0 = scmp.ne.s32.totalorder %s1380_s21, 0 }
  0x83   : > { %1361 = vsyncadd (%p1702_p12), [#allocation7], 4294966272  ;;  %v1179_v1 = vld [vmem:[%s1596_s14 + $0xc0] sm:$0xff]   ;;  %1027 = vmatprep.subr.bf16.mxu0 %v1178_v0  ;;  %v1183_v5 = vld [vmem:[%s1596_s14 + $0xc8] sm:$0xff]   ;;  %v335_v25 = vunpack.c.l.s4 %v1400_v24 }
  0x84   : > { %v1180_v2 = vld [vmem:[%s1596_s14] sm:$0xff]   ;;  %1049 = vmatprep.subr.bf16.mxu1 %v1179_v1  ;;  %v1184_v6 = vld [vmem:[%s1596_s14 + $0x8] sm:$0xff]   ;;  %v1187_v9 = vld [vmem:[%s1596_s14 + $0xd0] sm:$0xff]   ;;  %v338_v32 = vshrl.u32 %v337_v26, 7 }
  0x85   : > { %v1181_v3 = vld [vmem:[%s1596_s14 + $0x80] sm:$0xff]   ;;  %1028 = vmatpush3.bf16.msra.mxu0 %v1180_v2  ;;  %v1185_v7 = vld [vmem:[%s1596_s14 + $0x88] sm:$0xff]   ;;  %v1188_v10 = vld [vmem:[%s1596_s14 + $0x10] sm:$0xff]   ;;  %v336_v31 = vunpack.c.0.s8 %v335_v25 }
  0x86   : > { %1050 = vmatpush3.bf16.msra.mxu1 %v1181_v3  ;;  %1029 = vmatprep.subr.bf16.mxu0 %v1182_v4  ;;  %v1189_v11 = vld [vmem:[%s1596_s14 + $0x90] sm:$0xff]   ;;  %v1190_v12 = vld [vmem:[%s1596_s14 + $0x58] sm:$0xff]   ;;  %v1194_v16 = vld [vmem:[%s1596_s14 + $0x60] sm:$0xff]  }
  0x87   : > { %1051 = vmatprep.subr.bf16.mxu1 %v1183_v5  ;;  %v1191_v13 = vld [vmem:[%s1596_s14 + $0xd8] sm:$0xff]   ;;  %v1195_v17 = vld [vmem:[%s1596_s14 + $0xe0] sm:$0xff]   ;;  %v1198_v20 = vld [vmem:[%s1596_s14 + $0x68] sm:$0xff]   ;;  %v339_v37 = vsub.s32 %v336_v31, %v338_v32 }
  0x88   : > { %v1192_v14 = vld [vmem:[%s1596_s14 + $0x18] sm:$0xff]   ;;  %v1196_v18 = vld [vmem:[%s1596_s14 + $0x20] sm:$0xff]   ;;  %v1199_v21 = vld [vmem:[%s1596_s14 + $0xe8] sm:$0xff]  }
  0x89   : > { %1030 = vmatpush3.bf16.msra.mxu0 %v1184_v6  ;;  %v1193_v15 = vld [vmem:[%s1596_s14 + $0x98] sm:$0xff]   ;;  %v1197_v19 = vld [vmem:[%s1596_s14 + $0xa0] sm:$0xff]   ;;  %v1200_v22 = vld [vmem:[%s1596_s14 + $0x28] sm:$0xff]  }
  0x8a   : > { %1052 = vmatpush3.bf16.msra.mxu1 %v1185_v7  ;;  %1031 = vmatprep.subr.bf16.mxu0 %v1186_v8  ;;  %v1201_v23 = vld [vmem:[%s1596_s14 + $0xa8] sm:$0xff]   ;;  %v1202_v27 = vld [vmem:[%s1596_s14 + $0x70] sm:$0xff]   ;;  %v1206_v33 = vld [vmem:[%s1596_s14 + $0x78] sm:$0xff]  }
  0x8b   : > { %1053 = vmatprep.subr.bf16.mxu1 %v1187_v9  ;;  %v1203_v28 = vld [vmem:[%s1596_s14 + $0xf0] sm:$0xff]   ;;  %v1207_v34 = vld [vmem:[%s1596_s14 + $0xf8] sm:$0xff]   ;;  %v1210_v38 = vld [vmem:[%s1589_s28] ss:$8 sps:$4 sm:$0xff]  }
  0x8c   : > { %v1204_v29 = vld [vmem:[%s1596_s14 + $0x30] sm:$0xff]   ;;  %v1208_v35 = vld [vmem:[%s1596_s14 + $0x38] sm:$0xff]   ;;  %v1214_v40 = vld [vmem:[%s1589_s28 + $0x4] ss:$8 sps:$4 sm:$0xff]   ;;  %v340_v42 = vrot.slane %v1210_v38, %v339_v37 }
  0x8d   : > { %1032 = vmatpush3.bf16.msra.mxu0 %v1188_v10  ;;  %v1205_v30 = vld [vmem:[%s1596_s14 + $0xb0] sm:$0xff]   ;;  %v1209_v36 = vld [vmem:[%s1596_s14 + $0xb8] sm:$0xff]   ;;  %v347_v44 = vrot.slane %v1214_v40, %v339_v37 }
  0x8e   : > { %1054 = vmatpush3.bf16.msra.mxu1 %v1189_v11  ;;  %1033 = vmatprep.subr.bf16.mxu0 %v1190_v12  ;;  %v1212_v39 = vld [vmem:[%s1589_s28 + $0x10] ss:$8 sps:$4 sm:$0xff]   ;;  %v1215_v41 = vld [vmem:[%s1589_s28 + $0x14] ss:$8 sps:$4 sm:$0xff]  }
  0x8f   : > { %1055 = vmatprep.subr.bf16.mxu1 %v1191_v13  ;;  %v354_v43 = vrot.slane %v1212_v39, %v339_v37  ;;  %v361_v45 = vrot.slane %v1215_v41, %v339_v37 }
  0x91   : > { %1034 = vmatpush3.bf16.msra.mxu0 %v1192_v14  ;;  %v363_v46 = vcombine.high %v340_v42, %v354_v43  ;;  %v362_v47 = vcombine.low %v340_v42, %v354_v43  ;;  %v365_v48 = vcombine.high %v347_v44, %v361_v45  ;;  %v364_v49 = vcombine.low %v347_v44, %v361_v45 }
  0x92   : > { %1056 = vmatpush3.bf16.msra.mxu1 %v1193_v15  ;;  %1035 = vmatprep.subr.bf16.mxu0 %v1194_v16 }
  0x93   : > { %1057 = vmatprep.subr.bf16.mxu1 %v1195_v17  ;;  %v371_v50 = vpack.c.bf16 %v363_v46, %v363_v46  ;;  %v370_v51 = vpack.c.bf16 %v362_v47, %v362_v47  ;;  %v373_v52 = vpack.c.bf16 %v365_v48, %v365_v48  ;;  %v372_v53 = vpack.c.bf16 %v364_v49, %v364_v49 }
  0x95   : > { %1036 = vmatpush3.bf16.msra.mxu0 %v1196_v18  ;;  %662 = vmatprep.mubr.bf16.mxu0 %v371_v50 }
  0x96   : > { %1058 = vmatpush3.bf16.msra.mxu1 %v1197_v19  ;;  %1037 = vmatprep.subr.bf16.mxu0 %v1198_v20 }
  0x97   : > { %1059 = vmatprep.subr.bf16.mxu1 %v1199_v21  ;;  %702 = vmatprep.mubr.bf16.mxu1 %v373_v52 }
  0x99   : > { %1038 = vmatpush3.bf16.msra.mxu0 %v1200_v22 }
  0x9a   : > { %1060 = vmatpush3.bf16.msra.mxu1 %v1201_v23  ;;  %1039 = vmatprep.subr.bf16.mxu0 %v1202_v27 }
  0x9b   : > { %1061 = vmatprep.subr.bf16.mxu1 %v1203_v28 }
  0x9d   : > { %1040 = vmatpush3.bf16.msra.mxu0 %v1204_v29 }
  0x9e   : > { %1062 = vmatpush3.bf16.msra.mxu1 %v1205_v30  ;;  %1041 = vmatprep.subr.bf16.mxu0 %v1206_v33 }
  0x9f   : > { %1063 = vmatprep.subr.bf16.mxu1 %v1207_v34 }
  0xa1   : > { %1042 = vmatpush3.bf16.msra.mxu0 %v1208_v35 }
  0xa2   : > { %1064 = vmatpush3.bf16.msra.mxu1 %v1209_v36 }
  0xa4   : > { %663 = vmatmul.mubr.bf16.vlgmr.msra.gmra.mrb[0].mxu0 %v370_v51 }
  0xa5   : > { %703 = vmatmul.mubr.bf16.vlgmr.msra.gmra.mrb[0].mxu1 %v372_v53 }
 0x176   : > { %713 = sbr.rel (%p1008_p0) target bundleno = 383 (0x17f), region = 56 }
 0x177   : > { %v1043_v54 = vpop.f32.mrb[0].mxu0 }
 0x178   : > { %v1065_v55 = vpop.f32.mrb[0].mxu1  ;;  %v1044_v56 = vpop.f32.mrb[1].mxu0 }
 0x179   : > { %v1045_v57 = vadd.f32 %v1044_v56, %v1043_v54  ;;  %v1066_v58 = vpop.f32.mrb[1].mxu1  ;;  %v1046_v59 = vpop.f32.mrb[2].mxu0 }
 0x17a   : > { %v1067_v60 = vadd.f32 %v1066_v58, %v1065_v55  ;;  %v1068_v61 = vpop.f32.mrb[2].mxu1  ;;  %v1047_v62 = vpop.f32.mrb[3].mxu0 }
 0x17b   : > { %v1069_v63 = vpop.f32.mrb[3].mxu1 }
 0x17c   : > { %v705_v0 = vadd.f32 %v1067_v60, %v1045_v57 }
 0x17e   : > { %714 = vst [vmem:[#allocation2] sm:$0xff] %v705_v0 }
 0x17f PF: > { %p1009_p2 = scmp.le.s32.totalorder %s1380_s21, 0 }
 0x181   : > { %718 = sbr.rel (%p1009_p2) target bundleno = 393 (0x189), region = 60 }
 0x185   : > { %v719_v1 = vld [vmem:[#allocation2] sm:$0xff] (!%p1009_p2) }
 0x186   : > { %v720_v2 = vadd.f32 (!%p1009_p2), %v719_v1, %v705_v0 }
 0x188   : > { %721 = vst [vmem:[#allocation2] sm:$0xff] %v720_v2 }
 0x189 PF: > { %p1010_p4 = scmp.ne.s32.totalorder %s1380_s21, 1 }
 0x18a   : > { %v1216_v3 = vld [vmem:[#allocation8] sm:$0xff] (!%p1010_p4)   ;;  %v1401_v4 = vmov (!%p1010_p4), 0.0   ;;  %v1217_v5 = vld [vmem:[#allocation8 + $0x8] sm:$0xff] (!%p1010_p4)   ;;  %vm1402_vm0 = vmmov (!%p1010_p4), 0   ;;  %v1218_v6 = vld [vmem:[#allocation8 + $0x10] sm:$0xff] (!%p1010_p4)  }
 0x18b   : > { %725 = sbr.rel (%p1010_p4) target bundleno = 644 (0x284), region = 64  ;;  %1080 = vmatprep.subr.bf16.mxu0 (!%p1010_p4), %v1401_v4  ;;  %1096 = vmatprep.mubr.msk.bf16.mxu0 (!%p1010_p4), %vm1402_vm0, %v1401_v4  ;;  %v1219_v7 = vld [vmem:[#allocation8 + $0x18] sm:$0xff] (!%p1010_p4)   ;;  %v1220_v8 = vld [vmem:[#allocation8 + $0x20] sm:$0xff] (!%p1010_p4)   ;;  %v1221_v9 = vld [vmem:[#allocation8 + $0x28] sm:$0xff] (!%p1010_p4)  }
 0x18c   : > { %1081 = vmatpush3.bf16.msra.mxu0 (!%p1010_p4), %v1216_v3  ;;  %v1011_v11 = vld [vmem:[%s1685_s2] ss:$0 sm:$0xff] (!%p1010_p4)  ;;  %v1222_v13 = vld [vmem:[#allocation8 + $0x30] sm:$0xff] (!%p1010_p4)  }
 0x18d   : > { %1082 = vmatprep.subr.bf16.mxu0 (!%p1010_p4), %v1401_v4  ;;  %v1223_v15 = vld [vmem:[#allocation8 + $0x38] sm:$0xff] (!%p1010_p4)  }
 0x18e   : > { %v1012_v17 = vld [vmem:[%s1687_s4] ss:$0 sm:$0xff] (!%p1010_p4) }
 0x18f   : > { %v726_v10 = vld [vmem:[#allocation2] sm:$0xff] (!%p1010_p4) }
 0x190   : > { %1083 = vmatpush3.bf16.msra.mxu0 (!%p1010_p4), %v1217_v5  ;;  %v734_v12 = vadd.f32 (!%p1010_p4), %v1011_v11, %v726_v10 }
 0x191   : > { %1084 = vmatprep.subr.bf16.mxu0 (!%p1010_p4), %v1401_v4 }
 0x192   : > { %v735_v14 = vmax.f32 %v734_v12, 0.0 }
 0x194   : > { %1085 = vmatpush3.bf16.msra.mxu0 %v1218_v6  ;;  %v736_v16 = vpack.c.bf16 %v735_v14, %v735_v14 }
 0x195   : > { %1086 = vmatprep.subr.bf16.mxu0 %v1401_v4 }
 0x198   : > { %1087 = vmatpush3.bf16.msra.mxu0 %v1219_v7 }
 0x199   : > { %1088 = vmatprep.subr.bf16.mxu0 %v1401_v4 }
 0x19c   : > { %1089 = vmatpush3.bf16.msra.mxu0 %v1220_v8 }
 0x19d   : > { %1090 = vmatprep.subr.bf16.mxu0 %v1401_v4 }
 0x1a0   : > { %1091 = vmatpush3.bf16.msra.mxu0 %v1221_v9 }
 0x1a1   : > { %1092 = vmatprep.subr.bf16.mxu0 %v1401_v4 }
 0x1a4   : > { %1093 = vmatpush3.bf16.msra.mxu0 %v1222_v13 }
 0x1a5   : > { %1094 = vmatprep.subr.bf16.mxu0 %v1401_v4 }
 0x1a8   : > { %1095 = vmatpush3.bf16.msra.mxu0 %v1223_v15 }
 0x1ab   : > { %1097 = vmatmul.mubr.bf16.vlgmr.msra.gmra.mrb[0].mxu0 %v736_v16 }
 0x27e   : > { %v842_v18 = vpop.f32.mrb[0].mxu0 }
 0x27f   : > { %v843_v19 = vadd.f32 %v1012_v17, %v842_v18  ;;  %v1098_v20 = vpop.f32.mrb[1].mxu0 }
 0x280   : > { %v845_v21 = vpop.f32.mrb[2].mxu0 }
 0x281   : > { %v848_v22 = vmax.f32 %v843_v19, 0.0  ;;  %v1099_v23 = vpop.f32.mrb[3].mxu0 }
 0x283   : > { %849 = vst [vmem:[#allocation9] sm:$0xff] %v848_v22 }
 0x284 PF: > { %p1021_p6 = scmp.ne.s32.totalorder %s1465_s24, 1 }
 0x286   : > { %852 = sbr.rel (%p1021_p6) target bundleno = 672 (0x2a0), region = 68 }
 0x28d   : > { %858 = vsyncadd [#allocation5], 96  ;;  %s1403_s26 = smov [#allocation9]  }
 0x28e   : > { %s863_s7 = sshll.u32 %s1403_s26, 4  ;;  %s864_s7 = int_to_ptr.vmem [resolvable:$true] %s863_s7 }
 0x28f   : > { %s1304_s11 = scalar_lea.vmem %s864_s7, 32  ;;  %s1308_s13 = scalar_lea.vmem %s864_s7, 128 }
 0x290   : > { %p1305_p7 = scmp.ne.s32.totalorder %s864_s7, %s1304_s11  ;;  %p1309_p9 = scmp.lt.s32.totalorder %s864_s7, %s864_s7 }
 0x291   : > { %p1310_p11 = scmp.lt.s32.totalorder %s1308_s13, %s1304_s11 }
 0x293   : > { %p1311_p13 = por %p1310_p11, %p1309_p9 }
 0x295   : > { %p1312_p3 = pnand %p1311_p13, %p1305_p7 }
 0x297   : > { %1315 = shalt.err (!%p1312_p3)
}
 0x298   : > { %s1316_s16 = scalar_lea.hbm %s1688_s5, 32 }
 0x299   : > { %p1317_p8 = scmp.ne.s32.totalorder %s1688_s5, %s1316_s16  ;;  %p1320_p5 = scmp.lt.u32.totalorder %s1316_s16, %s1688_s5 }
 0x29b   : > { %p1322_p10 = pnand %p1320_p5, %p1317_p8 }
 0x29d   : > { %1325 = shalt.err (!%p1322_p10)
}
 0x29e   : > { %s1404_s9 = smov 32   ;;  %s1405_s12 = smov 2  }
 0x29f   : > { %869 = dma.vmem_to_hbm [thread:$0]  %s864_s7, 32, %s1688_s5, [#allocation5], %s1404_s9, %s1404_s9, %s1405_s12  }
 0x2a0 PF: > { %p1115_p1 = scmp.eq.s32.totalorder %s1465_s24, 1 }
 0x2a2   : > { %1363 = dma.done.wait (%p1115_p1), [#allocation5], 128  }
 0x2a3   : > { %1365 = vsyncadd (%p1115_p1), [#allocation5], 4294967168 }
 0x2a4 PF: > { %s22_s23 = sadd.s32 1, %s1388_s23   ;;  %s1703_s18 = smov %s1372_s19 }
 0x2a5   : > { %p19_p12 = scmp.ge.s32.totalorder %s22_s23, 4   ;;  %s1704_s19 = smov %s1376_s20 }
 0x2a6   : > { %s1705_s20 = smov %s1491_s30  ;;  %s1706_s21 = smov %s1384_s22 }
 0x2a7   : > { %s1707_s22 = smov %s1709_s25  ;;  %21 = sbr.rel (!%p19_p12) target bundleno = 7 (0x7), region = 107 }
 0x2ae   :  { %879 = vsyncpa [#allocation4], 1 }
 0x2af   :  { %881 = vsyncpa [#allocation4 + $0x1], 1 }
 0x2b0   :  { %882 = vsyncpa [#allocation7], 1 }
 0x2b1   :  { %884 = vsyncpa [#allocation7 + $0x1], 1 }
 0x2b2   :  { %885 = vsyncpa [#allocation5], 1 }
 0x2b3   :  { %887 = vsyncpa [#allocation5 + $0x1], 1 }

</bundles_post_ra>
